<compile_context>
chip_gen: v5e
topology: v5e:2x2
jax: 0.10.0
libtpu: 0.0.40
codegen_flags: <defaults>
</compile_context>

<pallas_src>
import jax
import jax.numpy as jnp
from jax import lax
from jax.experimental import pallas as pl
from jax.experimental.pallas import tpu as pltpu

B, N, D, H = 2, 8, 32, 4          # batch, nodes/seq, hid_dim, n_heads
DH = D // H                       # head dim
BN = B * N
EPS = 1e-5                        # nn.LayerNorm default eps


def encoder_layer_kernel(x_ref, wqkv_ref, bqkv_ref, w3_ref, v7_ref, o_ref):
    # One grid step == one batch element (N rows). No cross-batch attention mask needed.
    x = x_ref[...]                                   # (N, D)  f32
    wqkv = wqkv_ref[...]                             # (D, 3D) bf16, 1/sqrt(DH) folded into Q cols
    bqkv = bqkv_ref[...]                             # (1, 3D) f32,  1/sqrt(DH) folded into bq
    wo, w1, w2 = w3_ref[0], w3_ref[1], w3_ref[2]     # (D, D)  bf16 each (sublane-major stack)
    bo, b1, b2, g1, be1, g2, be2 = [v7_ref[i] for i in range(7)]   # (D,) f32 each

    # --- fused QKV projection: one MXU push, bf16 operands, f32 accumulation ---
    qkv = jnp.dot(x.astype(jnp.bfloat16), wqkv,
                  preferred_element_type=jnp.float32) + bqkv       # (N, 3D) f32
    q16 = qkv[:, 0:D].astype(jnp.bfloat16)
    k16 = qkv[:, D:2 * D].astype(jnp.bfloat16)
    v16 = qkv[:, 2 * D:3 * D].astype(jnp.bfloat16)

    # --- per-head attention with the output projection fused into the loop ---
    attn_out = jnp.broadcast_to(bo, (N, D))                        # f32
    for h in range(H):
        qh = q16[:, h * DH:(h + 1) * DH]
        kh = k16[:, h * DH:(h + 1) * DH]
        vh = v16[:, h * DH:(h + 1) * DH]
        # Contraction on the last dim of BOTH operands: no kh.T (no XLU transpose).
        energy = lax.dot_general(qh, kh, (((1,), (1,)), ((), ())),
                                 preferred_element_type=jnp.float32)        # (N, N) f32
        m = jnp.max(energy, axis=-1, keepdims=True)
        p = jnp.exp(energy - m)                                             # f32
        denom = jnp.sum(p, axis=-1, keepdims=True)
        ctx_h = jnp.dot(p.astype(jnp.bfloat16), vh,
                        preferred_element_type=jnp.float32)                 # (N, DH)
        # Deferred softmax normalization: scale the small (N, DH) tile, EUP reciprocal.
        ctx_h = ctx_h * pl.reciprocal(denom, approx=True)
        attn_out = attn_out + jnp.dot(ctx_h.astype(jnp.bfloat16),
                                      wo[h * DH:(h + 1) * DH, :],
                                      preferred_element_type=jnp.float32)

    # --- residual + LayerNorm 1 (two-pass variance, f32 VPU math) ---
    h1 = x + attn_out
    mu1 = jnp.mean(h1, axis=-1, keepdims=True)
    c1 = h1 - mu1
    var1 = jnp.mean(c1 * c1, axis=-1, keepdims=True)
    h1 = c1 * lax.rsqrt(var1 + EPS) * g1 + be1

    # --- positionwise feedforward: relu(h1 W1 + b1) W2 + b2, bf16 MXU operands ---
    f = jnp.maximum(jnp.dot(h1.astype(jnp.bfloat16), w1,
                            preferred_element_type=jnp.float32) + b1, 0.0)
    f = jnp.dot(f.astype(jnp.bfloat16), w2,
                preferred_element_type=jnp.float32) + b2

    # --- residual + LayerNorm 2 ---
    h2 = h1 + f
    mu2 = jnp.mean(h2, axis=-1, keepdims=True)
    c2 = h2 - mu2
    var2 = jnp.mean(c2 * c2, axis=-1, keepdims=True)
    o_ref[...] = c2 * lax.rsqrt(var2 + EPS) * g2 + be2


def pack_params(p):
    """One-time host-side packing (call at parameter-load time, NOT per forward)."""
    inv_scale = 1.0 / jnp.sqrt(jnp.float32(DH))
    wqkv = jnp.concatenate([p["wq"] * inv_scale, p["wk"], p["wv"]],
                           axis=1).astype(jnp.bfloat16)                        # (D, 3D)
    bqkv = jnp.concatenate([p["bq"] * inv_scale, p["bk"], p["bv"]], axis=1)    # (1, 3D) f32
    w3 = jnp.stack([p["wo"], p["w1"], p["w2"]], axis=0).astype(jnp.bfloat16)   # (3, D, D)
    v7 = jnp.concatenate([p["bo"], p["b1"], p["b2"],
                          p["g1"], p["be1"], p["g2"], p["be2"]], axis=0)       # (7, D) f32
    return {"wqkv": wqkv, "bqkv": bqkv, "w3": w3, "v7": v7}


@jax.jit
def transformer_encoder_layer(x, packed):
    x2d = x.reshape(BN, D)   # batch folded into rows; per-batch tiles picked by the grid
    out2d = pl.pallas_call(
        encoder_layer_kernel,
        out_shape=jax.ShapeDtypeStruct((BN, D), jnp.float32),
        grid=(B,),
        in_specs=[
            pl.BlockSpec((N, D), lambda b: (b, 0)),          # x rows of this batch element
            pl.BlockSpec((D, 3 * D), lambda b: (0, 0)),      # fused QKV weights (resident)
            pl.BlockSpec((1, 3 * D), lambda b: (0, 0)),      # fused QKV bias
            pl.BlockSpec((3, D, D), lambda b: (0, 0, 0)),    # wo / w1 / w2 stack
            pl.BlockSpec((7, D), lambda b: (0, 0)),          # bo,b1,b2,g1,be1,g2,be2
        ],
        out_specs=pl.BlockSpec((N, D), lambda b: (b, 0)),
        compiler_params=pltpu.CompilerParams(
            dimension_semantics=("parallel",)),              # v7x: one batch per TensorCore
    )(x2d, packed["wqkv"], packed["bqkv"], packed["w3"], packed["v7"])
    return out2d.reshape(B, N, D)


def reference(x, p):
    """Pure-JAX f32 reference matching the PyTorch forward (eval mode)."""
    def ln(h, g, b):
        mu = h.mean(-1, keepdims=True)
        var = ((h - mu) ** 2).mean(-1, keepdims=True)
        return (h - mu) / jnp.sqrt(var + EPS) * g + b

    q = x @ p["wq"] + p["bq"]
    k = x @ p["wk"] + p["bk"]
    v = x @ p["wv"] + p["bv"]
    qh = q.reshape(B, N, H, DH).transpose(0, 2, 1, 3)
    kh = k.reshape(B, N, H, DH).transpose(0, 2, 1, 3)
    vh = v.reshape(B, N, H, DH).transpose(0, 2, 1, 3)
    energy = jnp.einsum("bhqd,bhkd->bhqk", qh, kh) / jnp.sqrt(jnp.float32(DH))
    attn = jax.nn.softmax(energy, axis=-1)
    ctx = jnp.einsum("bhqk,bhkd->bhqd", attn, vh).transpose(0, 2, 1, 3).reshape(B, N, D)
    attn_out = ctx @ p["wo"] + p["bo"]
    h1 = ln(x + attn_out, p["g1"], p["be1"])
    f = jnp.maximum(h1 @ p["w1"] + p["b1"], 0.0) @ p["w2"] + p["b2"]
    return ln(h1 + f, p["g2"], p["be2"])


def make_params(key):
    keys = jax.random.split(key, 12)
    def mat(k):
        return jax.random.normal(k, (D, D), jnp.float32) * 0.05
    def vec(k):
        return jax.random.normal(k, (1, D), jnp.float32) * 0.02
    return {
        "wq": mat(keys[0]), "bq": vec(keys[1]),
        "wk": mat(keys[2]), "bk": vec(keys[3]),
        "wv": mat(keys[4]), "bv": vec(keys[5]),
        "wo": mat(keys[6]), "bo": vec(keys[7]),
        "w1": mat(keys[8]), "b1": vec(keys[9]),
        "w2": mat(keys[10]), "b2": vec(keys[11]),
        "g1": jnp.ones((1, D), jnp.float32), "be1": jnp.zeros((1, D), jnp.float32),
        "g2": jnp.ones((1, D), jnp.float32), "be2": jnp.zeros((1, D), jnp.float32),
    }


if __name__ == "__main__":
    key = jax.random.PRNGKey(0)
    k_x, k_p = jax.random.split(key)
    x = jax.random.normal(k_x, (B, N, D), jnp.float32)
    params = make_params(k_p)
    packed = pack_params(params)            # packed once, reused across forwards

    out = jax.block_until_ready(transformer_encoder_layer(x, packed))
    ref = jax.block_until_ready(reference(x, params))

    assert out.shape == (B, N, D)
    # Tolerance covers bf16 MXU operands (weights + activation casts at each dot) and the
    # EUP approximate reciprocal in the softmax denominator; all other math stays in f32.
    assert jnp.allclose(out, ref, atol=2e-2, rtol=2e-2), float(jnp.max(jnp.abs(out - ref)))
    print("KERNEL_OK")
</pallas_src>

<mosaic_0001>
module attributes {stable_mosaic.version = 11 : i64} {
  func.func @encoder_layer_kernel(%arg0: i32, %arg1: memref<8x32xf32, #tpu.memory_space<vmem>>, %arg2: memref<32x96xbf16, #tpu.memory_space<vmem>>, %arg3: memref<1x96xf32, #tpu.memory_space<vmem>>, %arg4: memref<3x32x32xbf16, #tpu.memory_space<vmem>>, %arg5: memref<7x32xf32, #tpu.memory_space<vmem>>, %arg6: memref<8x32xf32, #tpu.memory_space<vmem>>) attributes {dimension_semantics = [#tpu.dimension_semantics<parallel>], iteration_bounds = array<i64: 2>, scalar_prefetch = 0 : i64, scratch_operands = 0 : i64, tpu.core_type = #tpu.core_type<tc>, window_params = [{transform_indices = @transform_0, window_bounds = array<i64: 8, 32>}, {pipeline_mode = #tpu.pipeline_mode<synchronous>, transform_indices = @transform_1, window_bounds = array<i64: 32, 96>}, {pipeline_mode = #tpu.pipeline_mode<synchronous>, transform_indices = @transform_2, window_bounds = array<i64: 1, 96>}, {pipeline_mode = #tpu.pipeline_mode<synchronous>, transform_indices = @transform_3, window_bounds = array<i64: 3, 32, 32>}, {pipeline_mode = #tpu.pipeline_mode<synchronous>, transform_indices = @transform_4, window_bounds = array<i64: 7, 32>}, {transform_indices = @transform_5, window_bounds = array<i64: 8, 32>}]} {
    %c0 = arith.constant 0 : index
    %c0_0 = arith.constant 0 : index
    %0 = vector.load %arg1[%c0, %c0_0] : memref<8x32xf32, #tpu.memory_space<vmem>>, vector<8x32xf32>
    %c0_1 = arith.constant 0 : index
    %c0_2 = arith.constant 0 : index
    %1 = vector.load %arg2[%c0_1, %c0_2] : memref<32x96xbf16, #tpu.memory_space<vmem>>, vector<32x96xbf16>
    %c0_3 = arith.constant 0 : index
    %c0_4 = arith.constant 0 : index
    %2 = vector.load %arg3[%c0_3, %c0_4] : memref<1x96xf32, #tpu.memory_space<vmem>>, vector<1x96xf32>
    %c0_5 = arith.constant 0 : index
    %c0_6 = arith.constant 0 : index
    %c0_7 = arith.constant 0 : index
    %3 = vector.load %arg4[%c0_5, %c0_6, %c0_7] : memref<3x32x32xbf16, #tpu.memory_space<vmem>>, vector<1x32x32xbf16>
    %4 = vector.shape_cast %3 : vector<1x32x32xbf16> to vector<32x32xbf16>
    %c1 = arith.constant 1 : index
    %c0_8 = arith.constant 0 : index
    %c0_9 = arith.constant 0 : index
    %5 = vector.load %arg4[%c1, %c0_8, %c0_9] : memref<3x32x32xbf16, #tpu.memory_space<vmem>>, vector<1x32x32xbf16>
    %6 = vector.shape_cast %5 : vector<1x32x32xbf16> to vector<32x32xbf16>
    %c2 = arith.constant 2 : index
    %c0_10 = arith.constant 0 : index
    %c0_11 = arith.constant 0 : index
    %7 = vector.load %arg4[%c2, %c0_10, %c0_11] : memref<3x32x32xbf16, #tpu.memory_space<vmem>>, vector<1x32x32xbf16>
    %8 = vector.shape_cast %7 : vector<1x32x32xbf16> to vector<32x32xbf16>
    %c0_12 = arith.constant 0 : index
    %c0_13 = arith.constant 0 : index
    %9 = vector.load %arg5[%c0_12, %c0_13] : memref<7x32xf32, #tpu.memory_space<vmem>>, vector<1x32xf32>
    %10 = vector.shape_cast %9 : vector<1x32xf32> to vector<32xf32>
    %c1_14 = arith.constant 1 : index
    %c0_15 = arith.constant 0 : index
    %11 = vector.load %arg5[%c1_14, %c0_15] : memref<7x32xf32, #tpu.memory_space<vmem>>, vector<1x32xf32>
    %12 = vector.shape_cast %11 : vector<1x32xf32> to vector<32xf32>
    %c2_16 = arith.constant 2 : index
    %c0_17 = arith.constant 0 : index
    %13 = vector.load %arg5[%c2_16, %c0_17] : memref<7x32xf32, #tpu.memory_space<vmem>>, vector<1x32xf32>
    %14 = vector.shape_cast %13 : vector<1x32xf32> to vector<32xf32>
    %c3 = arith.constant 3 : index
    %c0_18 = arith.constant 0 : index
    %15 = vector.load %arg5[%c3, %c0_18] : memref<7x32xf32, #tpu.memory_space<vmem>>, vector<1x32xf32>
    %16 = vector.shape_cast %15 : vector<1x32xf32> to vector<32xf32>
    %c4 = arith.constant 4 : index
    %c0_19 = arith.constant 0 : index
    %17 = vector.load %arg5[%c4, %c0_19] : memref<7x32xf32, #tpu.memory_space<vmem>>, vector<1x32xf32>
    %18 = vector.shape_cast %17 : vector<1x32xf32> to vector<32xf32>
    %c5 = arith.constant 5 : index
    %c0_20 = arith.constant 0 : index
    %19 = vector.load %arg5[%c5, %c0_20] : memref<7x32xf32, #tpu.memory_space<vmem>>, vector<1x32xf32>
    %20 = vector.shape_cast %19 : vector<1x32xf32> to vector<32xf32>
    %c6 = arith.constant 6 : index
    %c0_21 = arith.constant 0 : index
    %21 = vector.load %arg5[%c6, %c0_21] : memref<7x32xf32, #tpu.memory_space<vmem>>, vector<1x32xf32>
    %22 = vector.shape_cast %21 : vector<1x32xf32> to vector<32xf32>
    %23 = arith.truncf %0 : vector<8x32xf32> to vector<8x32xbf16>
    %cst = arith.constant dense<0.000000e+00> : vector<8x96xf32>
    %24 = tpu.matmul %23, %1, %cst {dimension_numbers = #tpu.dot_dimension_numbers<[1], [0], [0], [1], [0, 0, 1, 1], [], []>} : vector<8x32xbf16>, vector<32x96xbf16>, vector<8x96xf32> -> vector<8x96xf32>
    %25 = vector.broadcast %2 : vector<1x96xf32> to vector<8x96xf32>
    %26 = arith.addf %24, %25 : vector<8x96xf32>
    %27 = vector.extract_strided_slice %26 {offsets = [0, 0], sizes = [8, 32], strides = [1, 1]} : vector<8x96xf32> to vector<8x32xf32>
    %28 = arith.truncf %27 : vector<8x32xf32> to vector<8x32xbf16>
    %29 = vector.extract_strided_slice %26 {offsets = [0, 32], sizes = [8, 32], strides = [1, 1]} : vector<8x96xf32> to vector<8x32xf32>
    %30 = arith.truncf %29 : vector<8x32xf32> to vector<8x32xbf16>
    %31 = vector.extract_strided_slice %26 {offsets = [0, 64], sizes = [8, 32], strides = [1, 1]} : vector<8x96xf32> to vector<8x32xf32>
    %32 = arith.truncf %31 : vector<8x32xf32> to vector<8x32xbf16>
    %33 = vector.shape_cast %10 : vector<32xf32> to vector<1x32xf32>
    %34 = vector.broadcast %33 : vector<1x32xf32> to vector<8x32xf32>
    %35 = vector.extract_strided_slice %28 {offsets = [0, 0], sizes = [8, 8], strides = [1, 1]} : vector<8x32xbf16> to vector<8x8xbf16>
    %36 = vector.extract_strided_slice %30 {offsets = [0, 0], sizes = [8, 8], strides = [1, 1]} : vector<8x32xbf16> to vector<8x8xbf16>
    %37 = vector.extract_strided_slice %32 {offsets = [0, 0], sizes = [8, 8], strides = [1, 1]} : vector<8x32xbf16> to vector<8x8xbf16>
    %cst_22 = arith.constant dense<0.000000e+00> : vector<8x8xf32>
    %38 = tpu.matmul %35, %36, %cst_22 {dimension_numbers = #tpu.dot_dimension_numbers<[1], [1], [0], [0], [0, 0, 1, 0], [], []>} : vector<8x8xbf16>, vector<8x8xbf16>, vector<8x8xf32> -> vector<8x8xf32>
    %cst_23 = arith.constant dense<0xFF800000> : vector<8xf32>
    %39 = vector.multi_reduction <maximumf>, %38, %cst_23 [1] : vector<8x8xf32> to vector<8xf32>
    %40 = vector.shape_cast %39 : vector<8xf32> to vector<8x1xf32>
    %41 = vector.broadcast %40 : vector<8x1xf32> to vector<8x8xf32>
    %42 = arith.subf %38, %41 : vector<8x8xf32>
    %43 = math.exp %42 : vector<8x8xf32>
    %cst_24 = arith.constant dense<0.000000e+00> : vector<8xf32>
    %44 = vector.multi_reduction <add>, %43, %cst_24 [1] : vector<8x8xf32> to vector<8xf32>
    %45 = vector.shape_cast %44 : vector<8xf32> to vector<8x1xf32>
    %46 = arith.truncf %43 : vector<8x8xf32> to vector<8x8xbf16>
    %cst_25 = arith.constant dense<0.000000e+00> : vector<8x8xf32>
    %47 = tpu.matmul %46, %37, %cst_25 {dimension_numbers = #tpu.dot_dimension_numbers<[1], [0], [0], [1], [0, 0, 1, 1], [], []>} : vector<8x8xbf16>, vector<8x8xbf16>, vector<8x8xf32> -> vector<8x8xf32>
    %48 = tpu.reciprocal %45 {approx = true} : vector<8x1xf32> -> vector<8x1xf32>
    %49 = vector.broadcast %48 : vector<8x1xf32> to vector<8x8xf32>
    %50 = arith.mulf %47, %49 : vector<8x8xf32>
    %51 = arith.truncf %50 : vector<8x8xf32> to vector<8x8xbf16>
    %52 = vector.extract_strided_slice %4 {offsets = [0, 0], sizes = [8, 32], strides = [1, 1]} : vector<32x32xbf16> to vector<8x32xbf16>
    %cst_26 = arith.constant dense<0.000000e+00> : vector<8x32xf32>
    %53 = tpu.matmul %51, %52, %cst_26 {dimension_numbers = #tpu.dot_dimension_numbers<[1], [0], [0], [1], [0, 0, 1, 1], [], []>} : vector<8x8xbf16>, vector<8x32xbf16>, vector<8x32xf32> -> vector<8x32xf32>
    %54 = arith.addf %34, %53 : vector<8x32xf32>
    %55 = vector.extract_strided_slice %28 {offsets = [0, 8], sizes = [8, 8], strides = [1, 1]} : vector<8x32xbf16> to vector<8x8xbf16>
    %56 = vector.extract_strided_slice %30 {offsets = [0, 8], sizes = [8, 8], strides = [1, 1]} : vector<8x32xbf16> to vector<8x8xbf16>
    %57 = vector.extract_strided_slice %32 {offsets = [0, 8], sizes = [8, 8], strides = [1, 1]} : vector<8x32xbf16> to vector<8x8xbf16>
    %cst_27 = arith.constant dense<0.000000e+00> : vector<8x8xf32>
    %58 = tpu.matmul %55, %56, %cst_27 {dimension_numbers = #tpu.dot_dimension_numbers<[1], [1], [0], [0], [0, 0, 1, 0], [], []>} : vector<8x8xbf16>, vector<8x8xbf16>, vector<8x8xf32> -> vector<8x8xf32>
    %cst_28 = arith.constant dense<0xFF800000> : vector<8xf32>
    %59 = vector.multi_reduction <maximumf>, %58, %cst_28 [1] : vector<8x8xf32> to vector<8xf32>
    %60 = vector.shape_cast %59 : vector<8xf32> to vector<8x1xf32>
    %61 = vector.broadcast %60 : vector<8x1xf32> to vector<8x8xf32>
    %62 = arith.subf %58, %61 : vector<8x8xf32>
    %63 = math.exp %62 : vector<8x8xf32>
    %cst_29 = arith.constant dense<0.000000e+00> : vector<8xf32>
    %64 = vector.multi_reduction <add>, %63, %cst_29 [1] : vector<8x8xf32> to vector<8xf32>
    %65 = vector.shape_cast %64 : vector<8xf32> to vector<8x1xf32>
    %66 = arith.truncf %63 : vector<8x8xf32> to vector<8x8xbf16>
    %cst_30 = arith.constant dense<0.000000e+00> : vector<8x8xf32>
    %67 = tpu.matmul %66, %57, %cst_30 {dimension_numbers = #tpu.dot_dimension_numbers<[1], [0], [0], [1], [0, 0, 1, 1], [], []>} : vector<8x8xbf16>, vector<8x8xbf16>, vector<8x8xf32> -> vector<8x8xf32>
    %68 = tpu.reciprocal %65 {approx = true} : vector<8x1xf32> -> vector<8x1xf32>
    %69 = vector.broadcast %68 : vector<8x1xf32> to vector<8x8xf32>
    %70 = arith.mulf %67, %69 : vector<8x8xf32>
    %71 = arith.truncf %70 : vector<8x8xf32> to vector<8x8xbf16>
    %72 = vector.extract_strided_slice %4 {offsets = [8, 0], sizes = [8, 32], strides = [1, 1]} : vector<32x32xbf16> to vector<8x32xbf16>
    %cst_31 = arith.constant dense<0.000000e+00> : vector<8x32xf32>
    %73 = tpu.matmul %71, %72, %cst_31 {dimension_numbers = #tpu.dot_dimension_numbers<[1], [0], [0], [1], [0, 0, 1, 1], [], []>} : vector<8x8xbf16>, vector<8x32xbf16>, vector<8x32xf32> -> vector<8x32xf32>
    %74 = arith.addf %54, %73 : vector<8x32xf32>
    %75 = vector.extract_strided_slice %28 {offsets = [0, 16], sizes = [8, 8], strides = [1, 1]} : vector<8x32xbf16> to vector<8x8xbf16>
    %76 = vector.extract_strided_slice %30 {offsets = [0, 16], sizes = [8, 8], strides = [1, 1]} : vector<8x32xbf16> to vector<8x8xbf16>
    %77 = vector.extract_strided_slice %32 {offsets = [0, 16], sizes = [8, 8], strides = [1, 1]} : vector<8x32xbf16> to vector<8x8xbf16>
    %cst_32 = arith.constant dense<0.000000e+00> : vector<8x8xf32>
    %78 = tpu.matmul %75, %76, %cst_32 {dimension_numbers = #tpu.dot_dimension_numbers<[1], [1], [0], [0], [0, 0, 1, 0], [], []>} : vector<8x8xbf16>, vector<8x8xbf16>, vector<8x8xf32> -> vector<8x8xf32>
    %cst_33 = arith.constant dense<0xFF800000> : vector<8xf32>
    %79 = vector.multi_reduction <maximumf>, %78, %cst_33 [1] : vector<8x8xf32> to vector<8xf32>
    %80 = vector.shape_cast %79 : vector<8xf32> to vector<8x1xf32>
    %81 = vector.broadcast %80 : vector<8x1xf32> to vector<8x8xf32>
    %82 = arith.subf %78, %81 : vector<8x8xf32>
    %83 = math.exp %82 : vector<8x8xf32>
    %cst_34 = arith.constant dense<0.000000e+00> : vector<8xf32>
    %84 = vector.multi_reduction <add>, %83, %cst_34 [1] : vector<8x8xf32> to vector<8xf32>
    %85 = vector.shape_cast %84 : vector<8xf32> to vector<8x1xf32>
    %86 = arith.truncf %83 : vector<8x8xf32> to vector<8x8xbf16>
    %cst_35 = arith.constant dense<0.000000e+00> : vector<8x8xf32>
    %87 = tpu.matmul %86, %77, %cst_35 {dimension_numbers = #tpu.dot_dimension_numbers<[1], [0], [0], [1], [0, 0, 1, 1], [], []>} : vector<8x8xbf16>, vector<8x8xbf16>, vector<8x8xf32> -> vector<8x8xf32>
    %88 = tpu.reciprocal %85 {approx = true} : vector<8x1xf32> -> vector<8x1xf32>
    %89 = vector.broadcast %88 : vector<8x1xf32> to vector<8x8xf32>
    %90 = arith.mulf %87, %89 : vector<8x8xf32>
    %91 = arith.truncf %90 : vector<8x8xf32> to vector<8x8xbf16>
    %92 = vector.extract_strided_slice %4 {offsets = [16, 0], sizes = [8, 32], strides = [1, 1]} : vector<32x32xbf16> to vector<8x32xbf16>
    %cst_36 = arith.constant dense<0.000000e+00> : vector<8x32xf32>
    %93 = tpu.matmul %91, %92, %cst_36 {dimension_numbers = #tpu.dot_dimension_numbers<[1], [0], [0], [1], [0, 0, 1, 1], [], []>} : vector<8x8xbf16>, vector<8x32xbf16>, vector<8x32xf32> -> vector<8x32xf32>
    %94 = arith.addf %74, %93 : vector<8x32xf32>
    %95 = vector.extract_strided_slice %28 {offsets = [0, 24], sizes = [8, 8], strides = [1, 1]} : vector<8x32xbf16> to vector<8x8xbf16>
    %96 = vector.extract_strided_slice %30 {offsets = [0, 24], sizes = [8, 8], strides = [1, 1]} : vector<8x32xbf16> to vector<8x8xbf16>
    %97 = vector.extract_strided_slice %32 {offsets = [0, 24], sizes = [8, 8], strides = [1, 1]} : vector<8x32xbf16> to vector<8x8xbf16>
    %cst_37 = arith.constant dense<0.000000e+00> : vector<8x8xf32>
    %98 = tpu.matmul %95, %96, %cst_37 {dimension_numbers = #tpu.dot_dimension_numbers<[1], [1], [0], [0], [0, 0, 1, 0], [], []>} : vector<8x8xbf16>, vector<8x8xbf16>, vector<8x8xf32> -> vector<8x8xf32>
    %cst_38 = arith.constant dense<0xFF800000> : vector<8xf32>
    %99 = vector.multi_reduction <maximumf>, %98, %cst_38 [1] : vector<8x8xf32> to vector<8xf32>
    %100 = vector.shape_cast %99 : vector<8xf32> to vector<8x1xf32>
    %101 = vector.broadcast %100 : vector<8x1xf32> to vector<8x8xf32>
    %102 = arith.subf %98, %101 : vector<8x8xf32>
    %103 = math.exp %102 : vector<8x8xf32>
    %cst_39 = arith.constant dense<0.000000e+00> : vector<8xf32>
    %104 = vector.multi_reduction <add>, %103, %cst_39 [1] : vector<8x8xf32> to vector<8xf32>
    %105 = vector.shape_cast %104 : vector<8xf32> to vector<8x1xf32>
    %106 = arith.truncf %103 : vector<8x8xf32> to vector<8x8xbf16>
    %cst_40 = arith.constant dense<0.000000e+00> : vector<8x8xf32>
    %107 = tpu.matmul %106, %97, %cst_40 {dimension_numbers = #tpu.dot_dimension_numbers<[1], [0], [0], [1], [0, 0, 1, 1], [], []>} : vector<8x8xbf16>, vector<8x8xbf16>, vector<8x8xf32> -> vector<8x8xf32>
    %108 = tpu.reciprocal %105 {approx = true} : vector<8x1xf32> -> vector<8x1xf32>
    %109 = vector.broadcast %108 : vector<8x1xf32> to vector<8x8xf32>
    %110 = arith.mulf %107, %109 : vector<8x8xf32>
    %111 = arith.truncf %110 : vector<8x8xf32> to vector<8x8xbf16>
    %112 = vector.extract_strided_slice %4 {offsets = [24, 0], sizes = [8, 32], strides = [1, 1]} : vector<32x32xbf16> to vector<8x32xbf16>
    %cst_41 = arith.constant dense<0.000000e+00> : vector<8x32xf32>
    %113 = tpu.matmul %111, %112, %cst_41 {dimension_numbers = #tpu.dot_dimension_numbers<[1], [0], [0], [1], [0, 0, 1, 1], [], []>} : vector<8x8xbf16>, vector<8x32xbf16>, vector<8x32xf32> -> vector<8x32xf32>
    %114 = arith.addf %94, %113 : vector<8x32xf32>
    %115 = arith.addf %0, %114 : vector<8x32xf32>
    %cst_42 = arith.constant dense<0.000000e+00> : vector<8xf32>
    %116 = vector.multi_reduction <add>, %115, %cst_42 [1] : vector<8x32xf32> to vector<8xf32>
    %117 = vector.shape_cast %116 : vector<8xf32> to vector<8x1xf32>
    %cst_43 = arith.constant 3.200000e+01 : f32
    %118 = vector.broadcast %cst_43 : f32 to vector<8x1xf32>
    %119 = arith.divf %117, %118 : vector<8x1xf32>
    %120 = vector.broadcast %119 : vector<8x1xf32> to vector<8x32xf32>
    %121 = arith.subf %115, %120 : vector<8x32xf32>
    %122 = arith.mulf %121, %121 : vector<8x32xf32>
    %cst_44 = arith.constant dense<0.000000e+00> : vector<8xf32>
    %123 = vector.multi_reduction <add>, %122, %cst_44 [1] : vector<8x32xf32> to vector<8xf32>
    %124 = vector.shape_cast %123 : vector<8xf32> to vector<8x1xf32>
    %cst_45 = arith.constant 3.200000e+01 : f32
    %125 = vector.broadcast %cst_45 : f32 to vector<8x1xf32>
    %126 = arith.divf %124, %125 : vector<8x1xf32>
    %cst_46 = arith.constant 9.99999974E-6 : f32
    %127 = vector.broadcast %cst_46 : f32 to vector<8x1xf32>
    %128 = arith.addf %126, %127 : vector<8x1xf32>
    %129 = math.rsqrt %128 : vector<8x1xf32>
    %130 = vector.broadcast %129 : vector<8x1xf32> to vector<8x32xf32>
    %131 = arith.mulf %121, %130 : vector<8x32xf32>
    %132 = vector.shape_cast %16 : vector<32xf32> to vector<1x32xf32>
    %133 = vector.broadcast %132 : vector<1x32xf32> to vector<8x32xf32>
    %134 = arith.mulf %131, %133 : vector<8x32xf32>
    %135 = vector.shape_cast %18 : vector<32xf32> to vector<1x32xf32>
    %136 = vector.broadcast %135 : vector<1x32xf32> to vector<8x32xf32>
    %137 = arith.addf %134, %136 : vector<8x32xf32>
    %138 = arith.truncf %137 : vector<8x32xf32> to vector<8x32xbf16>
    %cst_47 = arith.constant dense<0.000000e+00> : vector<8x32xf32>
    %139 = tpu.matmul %138, %6, %cst_47 {dimension_numbers = #tpu.dot_dimension_numbers<[1], [0], [0], [1], [0, 0, 1, 1], [], []>} : vector<8x32xbf16>, vector<32x32xbf16>, vector<8x32xf32> -> vector<8x32xf32>
    %140 = vector.shape_cast %12 : vector<32xf32> to vector<1x32xf32>
    %141 = vector.broadcast %140 : vector<1x32xf32> to vector<8x32xf32>
    %142 = arith.addf %139, %141 : vector<8x32xf32>
    %cst_48 = arith.constant 0.000000e+00 : f32
    %143 = vector.broadcast %cst_48 : f32 to vector<8x32xf32>
    %144 = arith.maximumf %142, %143 : vector<8x32xf32>
    %145 = arith.truncf %144 : vector<8x32xf32> to vector<8x32xbf16>
    %cst_49 = arith.constant dense<0.000000e+00> : vector<8x32xf32>
    %146 = tpu.matmul %145, %8, %cst_49 {dimension_numbers = #tpu.dot_dimension_numbers<[1], [0], [0], [1], [0, 0, 1, 1], [], []>} : vector<8x32xbf16>, vector<32x32xbf16>, vector<8x32xf32> -> vector<8x32xf32>
    %147 = vector.shape_cast %14 : vector<32xf32> to vector<1x32xf32>
    %148 = vector.broadcast %147 : vector<1x32xf32> to vector<8x32xf32>
    %149 = arith.addf %146, %148 : vector<8x32xf32>
    %150 = arith.addf %137, %149 : vector<8x32xf32>
    %cst_50 = arith.constant dense<0.000000e+00> : vector<8xf32>
    %151 = vector.multi_reduction <add>, %150, %cst_50 [1] : vector<8x32xf32> to vector<8xf32>
    %152 = vector.shape_cast %151 : vector<8xf32> to vector<8x1xf32>
    %cst_51 = arith.constant 3.200000e+01 : f32
    %153 = vector.broadcast %cst_51 : f32 to vector<8x1xf32>
    %154 = arith.divf %152, %153 : vector<8x1xf32>
    %155 = vector.broadcast %154 : vector<8x1xf32> to vector<8x32xf32>
    %156 = arith.subf %150, %155 : vector<8x32xf32>
    %157 = arith.mulf %156, %156 : vector<8x32xf32>
    %cst_52 = arith.constant dense<0.000000e+00> : vector<8xf32>
    %158 = vector.multi_reduction <add>, %157, %cst_52 [1] : vector<8x32xf32> to vector<8xf32>
    %159 = vector.shape_cast %158 : vector<8xf32> to vector<8x1xf32>
    %cst_53 = arith.constant 3.200000e+01 : f32
    %160 = vector.broadcast %cst_53 : f32 to vector<8x1xf32>
    %161 = arith.divf %159, %160 : vector<8x1xf32>
    %cst_54 = arith.constant 9.99999974E-6 : f32
    %162 = vector.broadcast %cst_54 : f32 to vector<8x1xf32>
    %163 = arith.addf %161, %162 : vector<8x1xf32>
    %164 = math.rsqrt %163 : vector<8x1xf32>
    %165 = vector.broadcast %164 : vector<8x1xf32> to vector<8x32xf32>
    %166 = arith.mulf %156, %165 : vector<8x32xf32>
    %167 = vector.shape_cast %20 : vector<32xf32> to vector<1x32xf32>
    %168 = vector.broadcast %167 : vector<1x32xf32> to vector<8x32xf32>
    %169 = arith.mulf %166, %168 : vector<8x32xf32>
    %170 = vector.shape_cast %22 : vector<32xf32> to vector<1x32xf32>
    %171 = vector.broadcast %170 : vector<1x32xf32> to vector<8x32xf32>
    %172 = arith.addf %169, %171 : vector<8x32xf32>
    %c0_55 = arith.constant 0 : index
    %c0_56 = arith.constant 0 : index
    %173 = vector.load %arg6[%c0_55, %c0_56] : memref<8x32xf32, #tpu.memory_space<vmem>>, vector<8x32xf32>
    tpu.vector_store %arg6[%c0_55, %c0_56], %172 {strides = array<i32>} : memref<8x32xf32, #tpu.memory_space<vmem>>, vector<8x32xf32>,
    return
  }
  func.func @transform_0(%arg0: i32) -> (i32, i32) {
    %c0_i32 = arith.constant 0 : i32
    %c0_i32_0 = arith.constant 0 : i32
    return %arg0, %c0_i32 : i32, i32
  }
  func.func @transform_1(%arg0: i32) -> (i32, i32) {
    %c0_i32 = arith.constant 0 : i32
    %c0_i32_0 = arith.constant 0 : i32
    %c0_i32_1 = arith.constant 0 : i32
    return %c0_i32, %c0_i32_0 : i32, i32
  }
  func.func @transform_2(%arg0: i32) -> (i32, i32) {
    %c0_i32 = arith.constant 0 : i32
    %c0_i32_0 = arith.constant 0 : i32
    %c0_i32_1 = arith.constant 0 : i32
    return %c0_i32, %c0_i32_0 : i32, i32
  }
  func.func @transform_3(%arg0: i32) -> (i32, i32, i32) {
    %c0_i32 = arith.constant 0 : i32
    %c0_i32_0 = arith.constant 0 : i32
    %c0_i32_1 = arith.constant 0 : i32
    %c0_i32_2 = arith.constant 0 : i32
    return %c0_i32, %c0_i32_0, %c0_i32_1 : i32, i32, i32
  }
  func.func @transform_4(%arg0: i32) -> (i32, i32) {
    %c0_i32 = arith.constant 0 : i32
    %c0_i32_0 = arith.constant 0 : i32
    %c0_i32_1 = arith.constant 0 : i32
    return %c0_i32, %c0_i32_0 : i32, i32
  }
  func.func @transform_5(%arg0: i32) -> (i32, i32) {
    %c0_i32 = arith.constant 0 : i32
    %c0_i32_0 = arith.constant 0 : i32
    return %arg0, %c0_i32 : i32, i32
  }
}

</mosaic_0001>

<bundles_post_ra>
// kernel: transformer_encoder_layer.1
= control target key start
LH: loop header
LB: loop body
LE: loop exit
PB: predicated region body
PF: predicated region fallthrough
CT: control target
= control target key end

     0   :  { %10 = vsyncpa [#allocation3], 0  ;;  %s1550_s0 = inlined_call_operand.hbm [shape: f32[16,32], index: 0, kind: input, shape index: {}]   ;;  %s1551_s1 = inlined_call_operand.hbm [shape: bf16[32,96], index: 1, kind: input, shape index: {}]   ;;  %s1552_s2 = inlined_call_operand.vmem [shape: f32[1,96], index: 2, kind: input, shape index: {}]   ;;  %s1553_s3 = inlined_call_operand.hbm [shape: bf16[3,32,32], index: 3, kind: input, shape index: {}]   ;;  %s1554_s4 = inlined_call_operand.hbm [shape: f32[7,32], index: 4, kind: input, shape index: {}]   ;;  %s1555_s5 = inlined_call_operand.hbm [shape: f32[16,32], index: 5, kind: output, shape index: {}]  }
   0x1   :  { %12 = vsyncpa [#allocation3 + $0x1], 0 }
   0x2   :  { %13 = vsyncpa [#allocation6], 0 }
   0x3   :  { %14 = vsyncpa [#allocation9], 0 }
   0x4   :  { %15 = vsyncpa [#allocation4], 0 }
   0x5   :  { %17 = vsyncpa [#allocation4 + $0x1], 0  ;;  %s1329_s18 = smov 0   ;;  %s1331_s19 = smov 0  }
   0x6   :  { %s1333_s20 = smov 0   ;;  %s1335_s21 = smov 0  }
   0x7 LB: > { %s175_s24 = sshll.u32 %s1551_s1, 4  ;;  %s1353_s25 = sadd.s32 4294967295, %s1280_s21   ;;  %s1280_s21 = sphi %s1335_s21, %s1566_s21   ;;  %s1276_s20 = sphi %s1333_s20, %s1565_s20   ;;  %s1272_s19 = sphi %s1331_s19, %s1564_s19   ;;  %s1268_s18 = sphi %s1329_s18, %s1563_s18   ;;  %s176_s24 = int_to_ptr.hbm [resolvable:$true] %s175_s24 }
   0x8   : > { %p903_p0 = scmp.ge.s32.totalorder %s1280_s21, 1  ;;  %p44_p1 = scmp.eq.s32.totalorder %s1353_s25, 0 }
   0x9   : > { %p164_p2 = scmp.lt.s32.totalorder %s1280_s21, 3  ;;  %s1282_s27 = smov [#allocation5]  }
   0xa   : > { %s177_s28 = sshll.u32 %s1282_s27, 4  ;;  %s192_s6 = sshll.u32 %s1553_s3, 4  ;;  %s178_s28 = int_to_ptr.vmem [resolvable:$true] %s177_s28  ;;  %s193_s6 = int_to_ptr.hbm [resolvable:$true] %s192_s6 }
   0xb   : > { %p1358_p3 = pnand %p903_p0, %p164_p2  ;;  %s207_s10 = sshll.u32 %s1554_s4, 4  ;;  %s208_s10 = int_to_ptr.hbm [resolvable:$true] %s207_s10 }
   0xc   : > { %s1283_s11 = smov [#allocation7]   ;;  %s1284_s13 = smov 64  }
   0xd   : > { %p981_p4 = pneg %p1358_p3  ;;  %s194_s12 = sshll.u32 %s1283_s11, 4  ;;  %s195_s12 = int_to_ptr.vmem [resolvable:$true] %s194_s12 }
   0xe   : > { %s1285_s14 = smov 4   ;;  %s1286_s15 = smov [#allocation8]  }
   0xf   : > { %p1370_p6 = pnand %p981_p4, %p44_p1  ;;  %s209_s16 = sshll.u32 %s1286_s15, 4  ;;  %s210_s16 = int_to_ptr.vmem [resolvable:$true] %s209_s16 }
  0x10   : > { %s902_s17 = sadd.s32 4294967294, %s1280_s21   ;;  %s1385_s22 = sadd.s32 1, %s1280_s21  }
  0x11   : > { %984 = dma.hbm_to_vmem [thread:$0]  (!%p1370_p6), %s176_s24, 256, %s178_s28, [#allocation6], %s1284_s13, %s1284_s13, %s1285_s14  }
  0x12   : > { %987 = dma.hbm_to_vmem [thread:$0]  (!%p1370_p6), %s193_s6, 768, %s195_s12, [#allocation6], %s1284_s13, %s1284_s13, %s1285_s14  }
  0x13   : > { %990 = dma.hbm_to_vmem [thread:$0]  (!%p1370_p6), %s208_s10, 128, %s210_s16, [#allocation9]  }
  0x14   : > { %s30_s23 = sadd.s32 1, %s1276_s20  ;;  %s27_s24 = ssub.s32 %s1280_s21, %s1385_s22 }
  0x15   : > { %p37_p7 = scmp.ne.s32.totalorder %s1276_s20, %s1272_s19  ;;  %p28_p8 = scmp.eq.s32.totalorder %s27_s24, 0 }
  0x16   : > { %p38_p9 = scmp.eq.s32.totalorder %s1280_s21, 0  ;;  %p43_p10 = scmp.ne.s32.totalorder %s1272_s19, %s1268_s18 }
  0x17   : > { %p151_p11 = scmp.eq.s32.totalorder %s1353_s25, 1  ;;  %p157_p0 = scmp.eq.s32.totalorder %s902_s17, 1 }
  0x18   : > { %s1397_s27 = scalar_select %p28_p8, %s1276_s20, %s30_s23  }
  0x19   : > { %p1401_p12 = por %p44_p1, %p43_p10  ;;  %p1405_p13 = por %p151_p11, %p37_p7 }
  0x1a   : > { %p39_p2 = por %p38_p9, %p37_p7  ;;  %s220_s30 = sand.u32 1, %s1276_s20  }
  0x1b   : > { %p1410_p4 = por %p157_p0, %p43_p10  ;;  %p1002_p6 = scmp.lt.s32.totalorder %s1280_s21, 2 }
  0x1c   : > { %s908_s7 = sshll.u32 %s220_s30, 3  ;;  %s909_s8 = sshll.u32 %s1280_s21, 3 }
  0x1d   : > { %s228_s11 = scalar_lea.hbm %s1550_s0, %s909_s8  ;;  %s224_s13 = scalar_lea.vmem [#allocation2], %s908_s7 }
  0x1e   : > { %s230_s12 = sshll.u32 %s228_s11, 4  ;;  %s232_s14 = sshll.u32 %s224_s13, 4  ;;  %s231_s12 = int_to_ptr.hbm [resolvable:$true] %s230_s12  ;;  %s233_s14 = int_to_ptr.vmem [resolvable:$true] %s232_s14 }
  0x1f   : > { %p1419_p8 = pnand %p1002_p6, %p39_p2  ;;  %s221_s16 = scalar_lea.sflag [#allocation3], %s220_s30 }
  0x20   : > { %s1176_s17 = sshra.s32 %s231_s12, 4  ;;  %s1183_s7 = scalar_lea.hbm %s1550_s0, 16  ;;  %s1177_s17 = int_to_ptr.hbm [resolvable:$true] %s1176_s17 }
  0x21   : > { %s1178_s23 = scalar_lea.hbm %s1177_s17, 8  ;;  %p1180_p9 = pneg %p1419_p8 }
  0x22   : > { %p1179_p7 = scmp.ne.s32.totalorder %s1177_s17, %s1178_s23  ;;  %p1184_p0 = scmp.lt.s32.totalorder %s1177_s17, %s1550_s0 }
  0x23   : > { %p1185_p2 = scmp.lt.s32.totalorder %s1183_s7, %s1178_s23 }
  0x24   : > { %p1181_p10 = pnand %p1180_p9, %p1179_p7 }
  0x25   : > { %p1186_p6 = por %p1185_p2, %p1184_p0 }
  0x26   : > { %p1182_p11 = pneg %p1181_p10 }
  0x28   : > { %p1187_p5 = pnand %p1186_p6, %p1182_p11 }
  0x2a   : > { %1190 = shalt.err (!%p1187_p5)
}
  0x2b   : > { %994 = dma.hbm_to_vmem [thread:$0]  (!%p1419_p8), %s231_s12, 128, %s233_s14, %s221_s16  }
  0x2c   : > { %241 = sbr.rel (%p1358_p3) target bundleno = 2337 (0x921), region = 40  ;;  %s1436_s30 = sand.u32 (!%p1358_p3), 1, %s1272_s19  }
  0x2d   : > { %s911_s11 = sshll.u32 (!%p1358_p3), %s1436_s30, 3  ;;  %s244_s13 = scalar_lea.sflag (!%p1358_p3), [#allocation3], %s1436_s30 }
  0x2e   : > { %s247_s17 = scalar_lea.vmem (!%p1358_p3), [#allocation2], %s911_s11 }
  0x31   : > { %1251 = dma.done.wait (%p1401_p12), %s244_s13, 128  }
  0x32   : > { %1253 = vsyncadd (%p1401_p12), %s244_s13, 4294967168 }
  0x33   : > { %1255 = dma.done.wait (%p44_p1), [#allocation6], 1024  }
  0x34   : > { %1257 = vsyncadd (%p44_p1), [#allocation6], 4294966272 }
  0x35   : > { %1259 = dma.done.wait (%p44_p1), [#allocation9], 128  }
  0x36   : > { %1261 = vsyncadd (%p44_p1), [#allocation9], 4294967168  ;;  %v960_v0 = vld [vmem:[#allocation5 + $0x8] sm:$0xff]  ;;  %v959_v1 = vld [vmem:[#allocation5] sm:$0xff]  ;;  %vm334_vm0 = vcmask 261120   ;;  %s1287_s12 = smov 120  }
  0x37   : > { %v1454_v2 = vld [vmem:[%s247_s17] sm:$0xff]  ;;  %344 = vmatpush.bf16.msra.mxu0 %v960_v0  ;;  %s1288_s14 = smov 64   ;;  %s1289_s15 = smov 96   ;;  %vm393_vm1 = vcmask 1043456   ;;  %vm358_vm2 = vcmask 64512  }
  0x38   : > { %v318_v3 = vpack.c.bf16 %v1454_v2, %v1454_v2  ;;  %v1056_v4 = vld [vmem:[%s1552_s2] ss:$0 sm:$0xff]  ;;  %s1290_s16 = smov 88   ;;  %s1291_s23 = smov 80   ;;  %v298_v31 = vld [vmem:[#allocation7 + $0x4] sm:$0xf] }
  0x39   : > { %s1292_s24 = smov 56   ;;  %s1293_s8 = smov 72   ;;  %v297_v29 = vld [vmem:[#allocation7] sm:$0xf]  ;;  %v494_v32 = vsel %vm393_vm1, %v298_v31, 0 }
  0x3a   : > { %v417_v30 = vsel %vm393_vm1, %v297_v29, 0  ;;  %s1294_s7 = smov 112   ;;  %s1295_s9 = smov 104  }
  0x3b   : > { %345 = vmatpush.bf16.msra.mxu0 %v959_v1  ;;  %426 = vmatpush.bf16.msra.mxu3 %v417_v30  ;;  %s1296_s10 = smov 48   ;;  %s1297_s13 = smov 40  }
  0x3c   : > { %s956_s17 = sshll.u32 %s1353_s25, 3  ;;  %s788_s25 = scalar_lea.sflag [#allocation4], %s1436_s30 }
  0x3e   : > { %924 = vmatmul.msk.bf16.vlgmr.msra.gmra.mxu0 %vm334_vm0, %v318_v3 }
  0x3f   : > { %503 = vmatpush.bf16.msrb.mxu0 %v494_v32 }
  0xbb   : > { %v347_v5 = vpop.f32.mrf.mxu0 }
  0xbc   : > { %v348_v6 = vadd.f32 %v1056_v4, %v347_v5 }
  0xbe   : > { %v351_v7 = vpack.c.bf16 %v348_v6, %v348_v6 }
  0xc0   : > { %v354_v8 = vunpack.c.l.b16 %v351_v7 }
  0xc2   : > { %v1462_v9 = vpack.c.b16 %v354_v8, %v354_v8  ;;  %v1057_v8 = vld [vmem:[#allocation8] ss:$0 sm:$0xff] }
  0xc3   : > { %v349_v10 = vpop.f32.mrf.mxu0 }
  0xc4   : > { %433 = vrot.lane.b32.xlu2 %v1462_v9, %s1287_s12  ;;  %388 = vrot.lane.b32.xlu1 %v1462_v9, %s1288_s14  ;;  %s798_s12 = scalar_lea.hbm %s1555_s5, %s956_s17  ;;  %s289_s14 = scalar_lea.vmem [#allocation10], %s911_s11 }
  0xc5   : > { %356 = vrot.lane.b32.xlu0 %v1462_v9, %s1289_s15  ;;  %s800_s15 = sshll.u32 %s289_s14, 4  ;;  %s1226_s11 = scalar_lea.hbm %s1555_s5, 16  ;;  %s801_s15 = int_to_ptr.vmem [resolvable:$true] %s800_s15 }
  0xcc   : > { %435 = vrot.lane.b32.xlu1 %v1462_v9, %s1290_s16  ;;  %s802_s16 = sshll.u32 %s798_s12, 4  ;;  %s803_s16 = int_to_ptr.hbm [resolvable:$true] %s802_s16 }
 0x11e   : > { %v434_v28 = vpop.permute.xlu2 %433 }
 0x136   : > { %v389_v11 = vpop.permute.xlu1 %388 }
 0x137   : > { %v357_v12 = vpop.permute.xlu0 %356  ;;  %v395_v13 = vsel %vm393_vm1, %v389_v11, 0 }
 0x138   : > { %v363_v14 = vsel %vm358_vm2, %v357_v12, 0  ;;  %404 = vmatpush.bf16.msra.mxu2 %v395_v13 }
 0x139   : > { %372 = vmatpush.bf16.xpose.msra.mxu1 %v363_v14 }
 0x13e   : > { %v436_v15 = vpop.permute.xlu1 %435 }
 0x13f   : > { %v441_v16 = vsel %vm358_vm2, %v436_v15, 0 }
 0x140   : > { %925 = vmatmul.msk.bf16.vlgmr.msra.gmra.mxu1 %vm358_vm2, %v351_v7  ;;  %450 = vmatpush.bf16.xpose.msrb.mxu2 %v441_v16 }
 0x1bd   : > { %v374_v17 = vpop.f32.mrf.mxu1 }
 0x1be   : > { %v378_v18 = vsel %vm358_vm2, %v374_v17, -inf }
 0x1bf   : > { %379 = vmax.xlane.f32.xlu0 %v378_v18 }
 0x1c5   : > { %v376_v19 = vpop.f32.mrf.mxu1 }
 0x1d3   : > { %512 = vrot.lane.b32.xlu0 %v1462_v9, %s1291_s23  ;;  %s1220_s23 = sshra.s32 %s803_s16, 4  ;;  %s1221_s23 = int_to_ptr.hbm [resolvable:$true] %s1220_s23 }
 0x1d4   : > { %p1227_p12 = scmp.lt.s32.totalorder %s1221_s23, %s1555_s5 }
 0x232   : > { %v380_v20 = vpop.xlane.xlu0 %379 }
 0x233   : > { %v381_v21 = vsub.f32 %v374_v17, %v380_v20  ;;  %v299_v20 = vld [vmem:[#allocation7 + $0x8] sm:$0xf] }
 0x235   : > { %v382_v22 = vmul.f32 1.442695, %v381_v21  ;;  %v571_v21 = vsel %vm393_vm1, %v299_v20, 0 }
 0x237   : > { %1064 = vpow2.f32 %v382_v22  ;;  %v300_v22 = vld [vmem:[#allocation7 + $0xc] sm:$0xf] }
 0x23d   : > { %v1065_v23 = vpop.eup %1064 }
 0x23e   : > { %v384_v24 = vsel %vm358_vm2, %v1065_v23, 0.0  ;;  %v387_v25 = vpack.c.bf16 %v1065_v23, %v1065_v23  ;;  %v648_v23 = vsel %vm393_vm1, %v300_v22, 0 }
 0x23f   : > { %385 = vadd.xlane.f32.xlu2 %v384_v24 }
 0x240   : > { %926 = vmatmul.msk.bf16.vlgmr.msra.gmra.mxu2 %vm358_vm2, %v387_v25 }
 0x245   : > { %v513_v26 = vpop.permute.xlu0 %512 }
 0x246   : > { %v518_v27 = vsel %vm358_vm2, %v513_v26, 0 }
 0x247   : > { %527 = vmatpush.bf16.xpose.msrb.mxu1 %v518_v27 }
 0x250   : > { %928 = vmatmul.msk.bf16.vlgmr.msrb.gmra.mxu2 %vm358_vm2, %v434_v28 }
 0x257   : > { %466 = vrot.lane.b32.xlu2 %v1462_v9, %s1292_s24  ;;  %s1222_s24 = scalar_lea.hbm %s1221_s23, 8 }
 0x258   : > { %p1223_p1 = scmp.ne.s32.totalorder %s1221_s23, %s1222_s24  ;;  %p1228_p8 = scmp.lt.s32.totalorder %s1226_s11, %s1222_s24 }
 0x25a   : > { %p1224_p3 = pnand %p1223_p1, %p1405_p13  ;;  %p1229_p7 = por %p1228_p8, %p1227_p12 }
 0x25c   : > { %p1225_p5 = pneg %p1224_p3 }
 0x25e   : > { %p1230_p9 = pnand %p1229_p7, %p1225_p5 }
 0x25f   : > { %589 = vrot.lane.b32.xlu2 %v1462_v9, %s1293_s8 }
 0x2b2   : > { %v386_v33 = vpop.xlane.xlu2 %385 }
 0x2b3   : > { %1066 = vrcp.f32 %v386_v33 }
 0x2b9   : > { %v1067_v37 = vpop.eup %1066 }
 0x2ba   : > { %v467_v34 = vpop.permute.xlu2 %466 }
 0x2bb   : > { %v472_v35 = vsel %vm393_vm1, %v467_v34, 0 }
 0x2bc   : > { %481 = vmatpush.bf16.msrb.mxu3 %v472_v35 }
 0x2c2   : > { %v590_v36 = vpop.permute.xlu2 %589 }
 0x2c3   : > { %v595_v38 = vsel %vm358_vm2, %v590_v36, 0  ;;  %v406_v39 = vpop.f32.mrf.mxu2 }
 0x2c4   : > { %v411_v40 = vmul.f32 %v1067_v37, %v406_v39  ;;  %604 = vmatpush.bf16.xpose.msra.mxu0 %v595_v38 }
 0x2c6   : > { %v412_v41 = vpack.c.bf16 %v411_v40, %v411_v40 }
 0x2c8   : > { %927 = vmatmul.msk.bf16.vlgmr.msra.gmra.mxu3 %vm358_vm2, %v412_v41 }
 0x2c9   : > { %580 = vmatpush.bf16.msra.mxu3 %v571_v21 }
 0x2cb   : > { %v408_v42 = vpop.f32.mrf.mxu2 }
 0x2d3   : > { %v452_v43 = vpop.f32.mrf.mxu2 }
 0x2d4   : > { %v456_v44 = vsel %vm358_vm2, %v452_v43, -inf }
 0x2d5   : > { %457 = vmax.xlane.f32.xlu1 %v456_v44 }
 0x2db   : > { %v454_v45 = vpop.f32.mrf.mxu2 }
 0x2ee   : > { %510 = vrot.lane.b32.xlu1 %v1462_v9, %s1294_s7 }
 0x348   : > { %v458_v46 = vpop.xlane.xlu1 %457 }
 0x349   : > { %v459_v47 = vsub.f32 %v452_v43, %v458_v46 }
 0x34b   : > { %v460_v48 = vmul.f32 1.442695, %v459_v47  ;;  %v428_v49 = vpop.f32.mrf.mxu3 }
 0x34c   : > { %v432_v10 = vadd.f32 %v1057_v8, %v428_v49 }
 0x34d   : > { %1068 = vpow2.f32 %v460_v48 }
 0x353   : > { %v1069_v50 = vpop.eup %1068  ;;  %v430_v51 = vpop.f32.mrf.mxu3 }
 0x354   : > { %v462_v52 = vsel %vm358_vm2, %v1069_v50, 0.0  ;;  %v465_v53 = vpack.c.bf16 %v1069_v50, %v1069_v50  ;;  %v1298_v50 = vmov 32.0  }
 0x355   : > { %463 = vadd.xlane.f32.xlu0 %v462_v52 }
 0x356   : > { %929 = vmatmul.msk.bf16.vlgmr.msrb.gmra.mxu3 %vm358_vm2, %v465_v53 }
 0x360   : > { %v511_v54 = vpop.permute.xlu1 %510 }
 0x361   : > { %931 = vmatmul.msk.bf16.vlgmr.msrb.gmra.mxu1 %vm358_vm2, %v511_v54 }
 0x369   : > { %587 = vrot.lane.b32.xlu0 %v1462_v9, %s1295_s9 }
 0x371   : > { %543 = vrot.lane.b32.xlu0 %v1462_v9, %s1296_s10 }
 0x379   : > { %620 = vrot.lane.b32.xlu0 %v1462_v9, %s1297_s13 }
 0x3c8   : > { %v464_v55 = vpop.xlane.xlu0 %463 }
 0x3c9   : > { %1070 = vrcp.f32 %v464_v55 }
 0x3cf   : > { %v1071_v56 = vpop.eup %1070 }
 0x3d9   : > { %v483_v57 = vpop.f32.mrf.mxu3 }
 0x3da   : > { %v488_v58 = vmul.f32 %v1071_v56, %v483_v57 }
 0x3db   : > { %v588_v59 = vpop.permute.xlu0 %587 }
 0x3dc   : > { %v489_v60 = vpack.c.bf16 %v488_v58, %v488_v58 }
 0x3de   : > { %930 = vmatmul.msk.bf16.vlgmr.msrb.gmra.mxu0 %vm358_vm2, %v489_v60  ;;  %v529_v61 = vpop.f32.mrf.mxu1 }
 0x3df   : > { %v533_v62 = vsel %vm358_vm2, %v529_v61, -inf }
 0x3e0   : > { %534 = vmax.xlane.f32.xlu2 %v533_v62  ;;  %v961_v62 = vld [vmem:[#allocation7 + $0x10] sm:$0xff] }
 0x3e1   : > { %v485_v63 = vpop.f32.mrf.mxu3 }
 0x3e2   : > { %v964_v63 = vld [vmem:[#allocation7 + $0x28] sm:$0xff] }
 0x3e3   : > { %v544_v0 = vpop.permute.xlu0 %543  ;;  %752 = vmatpush.bf16.msrb.mxu0 %v964_v63 }
 0x3e4   : > { %v549_v1 = vsel %vm393_vm1, %v544_v0, 0 }
 0x3e5   : > { %558 = vmatpush.bf16.msra.mxu2 %v549_v1 }
 0x3e6   : > { %v531_v3 = vpop.f32.mrf.mxu1 }
 0x3e7   : > { %v963_v3 = vld [vmem:[#allocation7 + $0x20] sm:$0xff] }
 0x3e8   : > { %753 = vmatpush.bf16.msrb.mxu0 %v963_v3 }
 0x3e9   : > { %657 = vmatpush.bf16.msrb.mxu2 %v648_v23 }
 0x3eb   : > { %v621_v4 = vpop.permute.xlu0 %620 }
 0x3ec   : > { %v626_v5 = vsel %vm393_vm1, %v621_v4, 0 }
 0x3ed   : > { %635 = vmatpush.bf16.msra.mxu1 %v626_v5 }
 0x3ee   : > { %934 = vmatmul.msk.bf16.vlgmr.msra.gmra.mxu0 %vm358_vm2, %v588_v59 }
 0x453   : > { %v535_v6 = vpop.xlane.xlu2 %534 }
 0x454   : > { %v536_v7 = vsub.f32 %v529_v61, %v535_v6 }
 0x456   : > { %v537_v9 = vmul.f32 1.442695, %v536_v7 }
 0x458   : > { %1072 = vpow2.f32 %v537_v9 }
 0x45b   : > { %v505_v11 = vpop.f32.mrf.mxu0 }
 0x45c   : > { %v509_v12 = vadd.f32 %v505_v11, %v432_v10  ;;  %v1058_v11 = vld [vmem:[#allocation8 + $0x3] ss:$0 sm:$0xff] }
 0x45e   : > { %v1073_v13 = vpop.eup %1072 }
 0x45f   : > { %v542_v14 = vpack.c.bf16 %v1073_v13, %v1073_v13  ;;  %v539_v15 = vsel %vm358_vm2, %v1073_v13, 0.0  ;;  %v1059_v13 = vld [vmem:[#allocation8 + $0x4] ss:$0 sm:$0xff] }
 0x460   : > { %540 = vadd.xlane.f32.xlu0 %v539_v15 }
 0x461   : > { %932 = vmatmul.msk.bf16.vlgmr.msra.gmra.mxu2 %vm358_vm2, %v542_v14 }
 0x463   : > { %v507_v16 = vpop.f32.mrf.mxu0 }
 0x46b   : > { %v606_v17 = vpop.f32.mrf.mxu0 }
 0x46c   : > { %v610_v18 = vsel %vm358_vm2, %v606_v17, -inf }
 0x46d   : > { %611 = vmax.xlane.f32.xlu1 %v610_v18  ;;  %v1060_v18 = vld [vmem:[#allocation8 + $0x1] ss:$0 sm:$0xff] }
 0x473   : > { %v608_v19 = vpop.f32.mrf.mxu0 }
 0x4d3   : > { %v541_v24 = vpop.xlane.xlu0 %540 }
 0x4d4   : > { %1074 = vrcp.f32 %v541_v24  ;;  %v1061_v24 = vld [vmem:[#allocation8 + $0x2] ss:$0 sm:$0xff] }
 0x4da   : > { %v1075_v28 = vpop.eup %1074 }
 0x4e0   : > { %v612_v25 = vpop.xlane.xlu1 %611 }
 0x4e1   : > { %v613_v26 = vsub.f32 %v606_v17, %v612_v25 }
 0x4e3   : > { %v614_v27 = vmul.f32 1.442695, %v613_v26 }
 0x4e4   : > { %v560_v29 = vpop.f32.mrf.mxu2 }
 0x4e5   : > { %1076 = vpow2.f32 %v614_v27  ;;  %v565_v30 = vmul.f32 %v1075_v28, %v560_v29 }
 0x4e7   : > { %v566_v31 = vpack.c.bf16 %v565_v30, %v565_v30 }
 0x4e9   : > { %933 = vmatmul.msk.bf16.vlgmr.msra.gmra.mxu3 %vm358_vm2, %v566_v31 }
 0x4eb   : > { %v1077_v32 = vpop.eup %1076 }
 0x4ec   : > { %v619_v33 = vpack.c.bf16 %v1077_v32, %v1077_v32  ;;  %v562_v34 = vpop.f32.mrf.mxu2  ;;  %v616_v35 = vsel %vm358_vm2, %v1077_v32, 0.0 }
 0x4ed   : > { %617 = vadd.xlane.f32.xlu2 %v616_v35 }
 0x4ee   : > { %935 = vmatmul.msk.bf16.vlgmr.msra.gmra.mxu1 %vm358_vm2, %v619_v33 }
 0x560   : > { %v618_v36 = vpop.xlane.xlu2 %617 }
 0x561   : > { %1078 = vrcp.f32 %v618_v36 }
 0x562   : > { %1080 = vrcp.f32 %v1298_v50 }
 0x567   : > { %v1079_v37 = vpop.eup %1078 }
 0x568   : > { %v1081_v51 = vpop.eup %1080 }
 0x569   : > { %v669_v52 = vmul.f32 32.0, %v1081_v51  ;;  %vm673_vm3 = vweird.f32 %v1081_v51 }
 0x56b   : > { %v637_v38 = vpop.f32.mrf.mxu1  ;;  %v670_v53 = vsub.f32 1.0, %v669_v52 }
 0x56c   : > { %v642_v39 = vmul.f32 %v1079_v37, %v637_v38  ;;  %v582_v40 = vpop.f32.mrf.mxu3 }
 0x56d   : > { %v586_v41 = vadd.f32 %v582_v40, %v509_v12  ;;  %v671_v54 = vmul.f32 %v1081_v51, %v670_v53 }
 0x56e   : > { %v643_v42 = vpack.c.bf16 %v642_v39, %v642_v39 }
 0x56f   : > { %v672_v55 = vadd.f32 %v1081_v51, %v671_v54 }
 0x570   : > { %936 = vmatmul.msk.bf16.vlgmr.msrb.gmra.mxu2 %vm358_vm2, %v643_v42 }
 0x571   : > { %v674_v56 = vsel %vm673_vm3, %v1081_v51, %v672_v55 }
 0x573   : > { %v639_v43 = vpop.f32.mrf.mxu1 }
 0x574   : > { %v584_v44 = vpop.f32.mrf.mxu3 }
 0x575   : > { %v1062_v44 = vld [vmem:[#allocation8 + $0x5] ss:$0 sm:$0xff] }
 0x5f3   : > { %v659_v45 = vpop.f32.mrf.mxu2 }
 0x5f4   : > { %v663_v46 = vadd.f32 %v659_v45, %v586_v41 }
 0x5f6   : > { %v664_v47 = vadd.f32 %v663_v46, %v1454_v2  ;;  %v962_v2 = vld [vmem:[#allocation7 + $0x18] sm:$0xff] }
 0x5f7   : > { %721 = vmatpush.bf16.msrb.mxu3 %v962_v2 }
 0x5f8   : > { %v665_v48 = vsel %vm334_vm0, %v664_v47, 0.0 }
 0x5f9   : > { %666 = vadd.xlane.f32.xlu1 %v665_v48 }
 0x5fb   : > { %v661_v49 = vpop.f32.mrf.mxu2  ;;  %722 = vmatpush.bf16.msrb.mxu3 %v961_v62 }
 0x66c   : > { %v667_v57 = vpop.xlane.xlu1 %666 }
 0x66d   : > { %v675_v58 = vmul.f32 %v674_v56, %v667_v57 }
 0x66f   : > { %v676_v59 = vsub.f32 %v664_v47, %v675_v58  ;;  %v1063_v47 = vld [vmem:[#allocation8 + $0x6] ss:$0 sm:$0xff] }
 0x671   : > { %v677_v60 = vmul.f32 %v676_v59, %v676_v59 }
 0x673   : > { %v678_v61 = vsel %vm334_vm0, %v677_v60, 0.0 }
 0x674   : > { %679 = vadd.xlane.f32.xlu2 %v678_v61 }
 0x6e7   : > { %v680_v0 = vpop.xlane.xlu2 %679 }
 0x6e8   : > { %v681_v1 = vmul.f32 %v680_v0, %v674_v56 }
 0x6ea   : > { %v682_v4 = vadd.f32 1e-05, %v681_v1 }
 0x6ec   : > { %1082 = vrsqrt.f32 %v682_v4  ;;  %vm689_vm5 = vweird.f32 %v682_v4 }
 0x6f2   : > { %v1083_v5 = vpop.eup %1082 }
 0x6f3   : > { %v684_v6 = vmul.f32 %v1083_v5, %v682_v4  ;;  %vm690_vm4 = vweird.f32 %v1083_v5 }
 0x6f4   : > { %vm691_vm6 = vmor %vm689_vm5, %vm690_vm4 }
 0x6f5   : > { %v685_v7 = vmul.f32 %v1083_v5, %v684_v6 }
 0x6f7   : > { %v686_v8 = vmul.f32 0.5, %v685_v7 }
 0x6f9   : > { %v687_v9 = vsub.f32 1.5, %v686_v8 }
 0x6fb   : > { %v688_v10 = vmul.f32 %v1083_v5, %v687_v9 }
 0x6fd   : > { %v692_v12 = vsel %vm691_vm6, %v1083_v5, %v688_v10 }
 0x6fe   : > { %v693_v14 = vmul.f32 %v692_v12, %v676_v59 }
 0x700   : > { %v695_v15 = vmul.f32 %v1058_v11, %v693_v14 }
 0x702   : > { %v697_v16 = vadd.f32 %v1059_v13, %v695_v15 }
 0x704   : > { %v698_v17 = vpack.c.bf16 %v697_v16, %v697_v16 }
 0x706   : > { %945 = vmatmul.msk.bf16.vlgmr.msrb.gmra.mxu3 %vm334_vm0, %v698_v17 }
 0x789   : > { %v724_v19 = vpop.f32.mrf.mxu3 }
 0x78a   : > { %v725_v20 = vadd.f32 %v1060_v18, %v724_v19 }
 0x78c   : > { %v728_v21 = vmax.f32 %v725_v20, 0.0 }
 0x78e   : > { %v729_v22 = vpack.c.bf16 %v728_v21, %v728_v21 }
 0x790   : > { %954 = vmatmul.msk.bf16.vlgmr.msrb.gmra.mxu0 %vm334_vm0, %v729_v22 }
 0x791   : > { %v726_v23 = vpop.f32.mrf.mxu3 }
 0x80d   : > { %v755_v25 = vpop.f32.mrf.mxu0 }
 0x80e   : > { %v756_v26 = vadd.f32 %v1061_v24, %v755_v25 }
 0x810   : > { %v759_v27 = vadd.f32 %v756_v26, %v697_v16 }
 0x812   : > { %v760_v28 = vsel %vm334_vm0, %v759_v27, 0.0 }
 0x813   : > { %761 = vadd.xlane.f32.xlu1 %v760_v28 }
 0x815   : > { %v757_v29 = vpop.f32.mrf.mxu0 }
 0x886   : > { %v762_v30 = vpop.xlane.xlu1 %761 }
 0x887   : > { %v763_v31 = vmul.f32 %v762_v30, %v674_v56 }
 0x889   : > { %v764_v32 = vsub.f32 %v759_v27, %v763_v31 }
 0x88b   : > { %v765_v33 = vmul.f32 %v764_v32, %v764_v32 }
 0x88d   : > { %v766_v34 = vsel %vm334_vm0, %v765_v33, 0.0 }
 0x88e   : > { %767 = vadd.xlane.f32.xlu2 %v766_v34 }
 0x901   : > { %v768_v35 = vpop.xlane.xlu2 %767 }
 0x902   : > { %v769_v36 = vmul.f32 %v768_v35, %v674_v56 }
 0x904   : > { %v770_v37 = vadd.f32 1e-05, %v769_v36 }
 0x906   : > { %1084 = vrsqrt.f32 %v770_v37  ;;  %vm777_vm8 = vweird.f32 %v770_v37 }
 0x90c   : > { %v1085_v38 = vpop.eup %1084 }
 0x90d   : > { %v772_v39 = vmul.f32 %v1085_v38, %v770_v37  ;;  %vm778_vm7 = vweird.f32 %v1085_v38 }
 0x90e   : > { %vm779_vm9 = vmor %vm777_vm8, %vm778_vm7 }
 0x90f   : > { %v773_v40 = vmul.f32 %v1085_v38, %v772_v39 }
 0x911   : > { %v774_v41 = vmul.f32 0.5, %v773_v40 }
 0x913   : > { %v775_v42 = vsub.f32 1.5, %v774_v41 }
 0x915   : > { %v776_v43 = vmul.f32 %v1085_v38, %v775_v42 }
 0x917   : > { %v780_v45 = vsel %vm779_vm9, %v1085_v38, %v776_v43 }
 0x918   : > { %v781_v46 = vmul.f32 %v780_v45, %v764_v32 }
 0x91a   : > { %v783_v48 = vmul.f32 %v1062_v44, %v781_v46 }
 0x91c   : > { %v785_v49 = vadd.f32 %v1063_v47, %v783_v48 }
 0x91e   : > { %786 = vst.msk [vmem:[%s289_s14] sm:$0xff] %vm334_vm0, %v785_v49 }
 0x91f   : > { %1233 = shalt.err (!%p1230_p9)
}
 0x920   : > { %979 = dma.vmem_to_hbm [thread:$0]  (%p1405_p13), %s801_s15, 128, %s803_s16, %s788_s25  }
 0x921 PF: > { %s814_s30 = sand.u32 1, %s1268_s18   ;;  %p1562_p10 = scmp.ge.s32.totalorder %s1280_s21, 2 }
 0x922   : > { %s815_s13 = scalar_lea.sflag [#allocation4], %s814_s30 }
 0x923   : > { %p996_p11 = pnand %p1562_p10, %p1410_p4 }
 0x925   : > { %p997_p0 = pneg %p996_p11 }
 0x927   : > { %1263 = dma.done.wait (%p997_p0), %s815_s13, 128  }
 0x928   : > { %1265 = vsyncadd (%p997_p0), %s815_s13, 4294967168  ;;  %p20_p2 = scmp.ge.s32.totalorder %s1385_s22, 4   ;;  %s1563_s18 = smov %s1272_s19 }
 0x929   : > { %s1564_s19 = smov %s1276_s20  ;;  %s1565_s20 = smov %s1397_s27 }
 0x92a   : > { %s1566_s21 = smov %s1385_s22  ;;  %22 = sbr.rel (!%p20_p2) target bundleno = 7 (0x7), region = 99 }
 0x92f   :  { %821 = vsyncpa [#allocation3], 1 }
 0x930   :  { %823 = vsyncpa [#allocation3 + $0x1], 1 }
 0x931   :  { %824 = vsyncpa [#allocation6], 1 }
 0x932   :  { %825 = vsyncpa [#allocation9], 1 }
 0x933   :  { %826 = vsyncpa [#allocation4], 1 }
 0x934   :  { %828 = vsyncpa [#allocation4 + $0x1], 1 }

</bundles_post_ra>
